<compile_context>
chip_gen: v7x
topology: tpu7x:2x2x1
jax: 0.10.0
libtpu: 0.0.40
codegen_flags: <defaults>
</compile_context>

<pallas_src>
import functools

import jax
import jax.numpy as jnp
from jax.experimental import pallas as pl
from jax.experimental.pallas import tpu as pltpu


# --------------------------------------------------------------------------
# Pallas kernel: one (batch, group) step of the grouped DoG convolution.
# --------------------------------------------------------------------------
def _dog_conv_kernel(x_ref, t_ref, o_ref, xpad_ref, *, H, W, w, G):
    # x_ref   : (1, 1, H, W)        input channel of this group (unpadded)
    # t_ref   : (1, G, w, W, W)     banded Toeplitz matrices (taps baked in)
    # o_ref   : (1, G, H, W)        the G output channels of this group
    # xpad_ref: (H + 2*pad, W)      VMEM scratch, height-padded copy of x
    pad = w // 2

    # Height zero-padding done in VMEM (avoids a jnp.pad round trip in HBM).
    # The halo is re-zeroed every step (cheap) so behaviour does not depend on
    # which core ran the first grid iteration.
    if pad > 0:
        zero_band = jnp.zeros((pad, W), jnp.float32)
        xpad_ref[0:pad, :] = zero_band
        xpad_ref[pad + H:2 * pad + H, :] = zero_band
    xpad_ref[pad:pad + H, :] = x_ref[0, 0, :, :]

    # w * G MXU matmuls, accumulated in f32.  The width axis of the
    # cross-correlation (incl. its zero padding) lives in the banded (W, W)
    # Toeplitz operand; only the filter-row shift dy is a sublane slice.
    accs = [jnp.zeros((H, W), jnp.float32) for _ in range(G)]
    for dy in range(w):
        x_dy = xpad_ref[dy:dy + H, :]                      # (H, W)
        for g in range(G):
            accs[g] = accs[g] + jnp.dot(
                x_dy, t_ref[0, g, dy, :, :],
                preferred_element_type=jnp.float32)

    for g in range(G):
        o_ref[0, g, :, :] = accs[g].astype(o_ref.dtype)


def dog_grouped_conv2d(x, filters, *, n_gaussian):
    """x: (N, C, H, W) f32; filters: (C*G, w, w) f32 -> (N, C*G, H, W) f32."""
    N, C, H, W = x.shape
    OC, w, _ = filters.shape
    G = n_gaussian
    assert OC == C * G
    assert w % 2 == 1, "odd kernel width expected (padding = w // 2)"
    pad = w // 2

    # Grouped-conv channel ordering: output channel oc = c*G + g reads input c.
    filt = filters.reshape(C, G, w, w).astype(jnp.float32)

    # Banded Toeplitz matrices implementing the width axis of the correlation.
    # T[c, g, dy, p, j] = filt[c, g, dy, p - j + pad] if 0 <= p-j+pad < w else 0
    # (width zero-padding is implicit in the band clipping).
    p_idx = jnp.arange(W)[:, None]                          # (W, 1)
    j_idx = jnp.arange(W)[None, :]                          # (1, W)
    dx = p_idx - j_idx + pad                                # (W, W)
    valid = (dx >= 0) & (dx < w)
    dx_c = jnp.clip(dx, 0, w - 1)
    toeplitz = jnp.where(valid[None, None, None, :, :],
                         filt[:, :, :, dx_c],
                         jnp.float32(0.0))                  # (C, G, w, W, W)

    kernel = functools.partial(_dog_conv_kernel, H=H, W=W, w=w, G=G)

    # Scoped-VMEM budget: double-buffered blocks + scratch, clamped to stay
    # within every generation's physical VMEM (v7x has only 64 MiB).
    x_block_b = H * W * 4
    t_block_b = G * w * W * W * 4
    o_block_b = G * H * W * 4
    scratch_b = (H + 2 * pad) * W * 4
    needed = 2 * (x_block_b + t_block_b + o_block_b) + scratch_b
    vmem_limit = int(min(64 * 2**20, max(32 * 2**20, 2 * needed)))

    return pl.pallas_call(
        kernel,
        out_shape=jax.ShapeDtypeStruct((N, OC, H, W), jnp.float32),
        grid_spec=pltpu.PrefetchScalarGridSpec(
            num_scalar_prefetch=0,
            grid=(N, C),
            in_specs=[
                # one input channel per (batch, group) step -- read once, not G times
                pl.BlockSpec((1, 1, H, W), lambda n, c: (n, c, 0, 0)),
                # the group's G Toeplitz filter banks
                pl.BlockSpec((1, G, w, W, W), lambda n, c: (c, 0, 0, 0, 0)),
            ],
            # all G output channels of the group in one block
            out_specs=pl.BlockSpec((1, G, H, W), lambda n, c: (n, c, 0, 0)),
            scratch_shapes=[pltpu.VMEM((H + 2 * pad, W), jnp.float32)],
        ),
        compiler_params=pltpu.CompilerParams(
            dimension_semantics=("parallel", "parallel"),
            vmem_limit_bytes=vmem_limit),
    )(x.astype(jnp.float32), toeplitz)


# --------------------------------------------------------------------------
# Plain-JAX glue: anisotropic Gaussian filter bank (Gaussian2DAnisotropic).
# --------------------------------------------------------------------------
def anisotropic_gaussian_filters(theta, sigma_x, sigma_y, amplitude, w):
    """Returns (C*G, w, w) rotated anisotropic Gaussian filters."""
    cos_t, sin_t = jnp.cos(theta), jnp.sin(theta)
    a = cos_t ** 2 / (2.0 * sigma_x ** 2) + sin_t ** 2 / (2.0 * sigma_y ** 2)
    b = (-jnp.sin(2.0 * theta) / (4.0 * sigma_x ** 2)
         + jnp.sin(2.0 * theta) / (4.0 * sigma_y ** 2))
    c = sin_t ** 2 / (2.0 * sigma_x ** 2) + cos_t ** 2 / (2.0 * sigma_y ** 2)

    half = w // 2
    coords = jnp.arange(-half, half + 1, dtype=jnp.float32)
    ys, xs = jnp.meshgrid(coords, coords, indexing="ij")    # (w, w)

    a = a[:, None, None]
    b = b[:, None, None]
    c = c[:, None, None]
    amp = amplitude[:, None, None]
    return amp * jnp.exp(-(a * xs ** 2 + 2.0 * b * xs * ys + c * ys ** 2))


def dog2d_anisotropic_forward(x, params, *, w, n_gaussian):
    """Forward pass of DoG2DAnisotropic: (filter_A - filter_B) grouped conv."""
    filt_a = anisotropic_gaussian_filters(
        params["theta"], params["sigma_x_a"], params["sigma_y_a"],
        params["amp_a"], w)
    filt_b = anisotropic_gaussian_filters(
        params["theta"], params["sigma_x_b"], params["sigma_y_b"],
        params["amp_b"], w)
    dog_filters = filt_a - filt_b                            # (C*G, w, w)
    return dog_grouped_conv2d(x, dog_filters, n_gaussian=n_gaussian)


# --------------------------------------------------------------------------
# Demo / self-check
# --------------------------------------------------------------------------
if __name__ == "__main__":
    N, C, H, W = 2, 4, 16, 16
    n_gaussian = 2
    w = 9                                    # odd -> padding = w // 2 = 4
    OC = C * n_gaussian

    key = jax.random.PRNGKey(0)
    keys = jax.random.split(key, 8)

    x = jax.random.normal(keys[0], (N, C, H, W), dtype=jnp.float32)

    # Deterministic parameter init (shapes match the module's __init__:
    # one flat vector of size n_gaussian * in_channels per parameter).
    params = {
        "theta": jax.random.normal(keys[1], (OC,), dtype=jnp.float32),
        # keep sigmas strictly positive / away from zero (as weights_init would)
        "sigma_x_a": 0.5 + jnp.abs(jax.random.normal(keys[2], (OC,))) * 0.5,
        "sigma_y_a": 0.5 + jnp.abs(jax.random.normal(keys[3], (OC,))) * 0.5,
        "sigma_x_b": 1.0 + jnp.abs(jax.random.normal(keys[4], (OC,))) * 0.5,
        "sigma_y_b": 1.0 + jnp.abs(jax.random.normal(keys[5], (OC,))) * 0.5,
        "amp_a": jax.random.normal(keys[6], (OC,), dtype=jnp.float32),
        "amp_b": jax.random.normal(keys[7], (OC,), dtype=jnp.float32),
    }

    out = dog2d_anisotropic_forward(x, params, w=w, n_gaussian=n_gaussian)
    out = jax.block_until_ready(out)
    assert out.shape == (N, OC, H, W), out.shape

    # Reference check against XLA's grouped conv (same cross-correlation
    # semantics as F.conv2d with groups=C, padding=w//2).
    filt_a = anisotropic_gaussian_filters(
        params["theta"], params["sigma_x_a"], params["sigma_y_a"],
        params["amp_a"], w)
    filt_b = anisotropic_gaussian_filters(
        params["theta"], params["sigma_x_b"], params["sigma_y_b"],
        params["amp_b"], w)
    dog = (filt_a - filt_b)[:, None, :, :]                   # (C*G, 1, w, w)
    pad = w // 2
    ref = jax.lax.conv_general_dilated(
        x, dog, window_strides=(1, 1),
        padding=[(pad, pad), (pad, pad)],
        dimension_numbers=("NCHW", "OIHW", "NCHW"),
        feature_group_count=C)
    ref = jax.block_until_ready(ref)

    # Tolerance accommodates MXU matmul precision modes (f32 accumulation);
    # any structural/indexing bug would produce O(1) errors and still fail.
    max_err = float(jnp.max(jnp.abs(out - ref)))
    assert max_err < 2e-2, max_err

    print("KERNEL_OK")
</pallas_src>

<mosaic_0001>
module attributes {stable_mosaic.version = 11 : i64} {
  func.func @_dog_conv_kernel(%arg0: i32, %arg1: i32, %arg2: memref<1x1x16x16xf32, #tpu.memory_space<vmem>>, %arg3: memref<1x2x9x16x16xf32, #tpu.memory_space<vmem>>, %arg4: memref<1x2x16x16xf32, #tpu.memory_space<vmem>>, %arg5: memref<24x16xf32, #tpu.memory_space<vmem>>) attributes {dimension_semantics = [#tpu.dimension_semantics<parallel>, #tpu.dimension_semantics<parallel>], iteration_bounds = array<i64: 2, 4>, scalar_prefetch = 0 : i64, scratch_operands = 1 : i64, tpu.core_type = #tpu.core_type<tc>, window_params = [{transform_indices = @transform_0, window_bounds = array<i64: 1, 1, 16, 16>}, {transform_indices = @transform_1, window_bounds = array<i64: 1, 2, 9, 16, 16>}, {transform_indices = @transform_2, window_bounds = array<i64: 1, 2, 16, 16>}]} {
    %cst = arith.constant 0.000000e+00 : f32
    %0 = vector.broadcast %cst : f32 to vector<4x16xf32>
    %c0 = arith.constant 0 : index
    %c0_0 = arith.constant 0 : index
    %1 = vector.load %arg5[%c0, %c0_0] : memref<24x16xf32, #tpu.memory_space<vmem>>, vector<4x16xf32>
    tpu.vector_store %arg5[%c0, %c0_0], %0 {strides = array<i32>} : memref<24x16xf32, #tpu.memory_space<vmem>>, vector<4x16xf32>,
    %c20 = arith.constant 20 : index
    %c0_1 = arith.constant 0 : index
    %2 = vector.load %arg5[%c20, %c0_1] : memref<24x16xf32, #tpu.memory_space<vmem>>, vector<4x16xf32>
    tpu.vector_store %arg5[%c20, %c0_1], %0 {strides = array<i32>} : memref<24x16xf32, #tpu.memory_space<vmem>>, vector<4x16xf32>,
    %c0_2 = arith.constant 0 : index
    %c0_3 = arith.constant 0 : index
    %c0_4 = arith.constant 0 : index
    %c0_5 = arith.constant 0 : index
    %3 = vector.load %arg2[%c0_2, %c0_3, %c0_4, %c0_5] : memref<1x1x16x16xf32, #tpu.memory_space<vmem>>, vector<1x1x16x16xf32>
    %4 = vector.shape_cast %3 : vector<1x1x16x16xf32> to vector<16x16xf32>
    %c4 = arith.constant 4 : index
    %c0_6 = arith.constant 0 : index
    %5 = vector.load %arg5[%c4, %c0_6] : memref<24x16xf32, #tpu.memory_space<vmem>>, vector<16x16xf32>
    tpu.vector_store %arg5[%c4, %c0_6], %4 {strides = array<i32>} : memref<24x16xf32, #tpu.memory_space<vmem>>, vector<16x16xf32>,
    %cst_7 = arith.constant 0.000000e+00 : f32
    %6 = vector.broadcast %cst_7 : f32 to vector<16x16xf32>
    %cst_8 = arith.constant 0.000000e+00 : f32
    %7 = vector.broadcast %cst_8 : f32 to vector<16x16xf32>
    %c0_9 = arith.constant 0 : index
    %c0_10 = arith.constant 0 : index
    %8 = vector.load %arg5[%c0_9, %c0_10] : memref<24x16xf32, #tpu.memory_space<vmem>>, vector<16x16xf32>
    %c0_11 = arith.constant 0 : index
    %c0_12 = arith.constant 0 : index
    %c0_13 = arith.constant 0 : index
    %c0_14 = arith.constant 0 : index
    %c0_15 = arith.constant 0 : index
    %9 = vector.load %arg3[%c0_11, %c0_12, %c0_13, %c0_14, %c0_15] : memref<1x2x9x16x16xf32, #tpu.memory_space<vmem>>, vector<1x1x1x16x16xf32>
    %10 = vector.shape_cast %9 : vector<1x1x1x16x16xf32> to vector<16x16xf32>
    %cst_16 = arith.constant dense<0.000000e+00> : vector<16x16xf32>
    %11 = tpu.matmul %8, %10, %cst_16 {dimension_numbers = #tpu.dot_dimension_numbers<[1], [0], [0], [1], [0, 0, 1, 1], [], []>} : vector<16x16xf32>, vector<16x16xf32>, vector<16x16xf32> -> vector<16x16xf32>
    %12 = arith.addf %6, %11 : vector<16x16xf32>
    %c0_17 = arith.constant 0 : index
    %c1 = arith.constant 1 : index
    %c0_18 = arith.constant 0 : index
    %c0_19 = arith.constant 0 : index
    %c0_20 = arith.constant 0 : index
    %13 = vector.load %arg3[%c0_17, %c1, %c0_18, %c0_19, %c0_20] : memref<1x2x9x16x16xf32, #tpu.memory_space<vmem>>, vector<1x1x1x16x16xf32>
    %14 = vector.shape_cast %13 : vector<1x1x1x16x16xf32> to vector<16x16xf32>
    %cst_21 = arith.constant dense<0.000000e+00> : vector<16x16xf32>
    %15 = tpu.matmul %8, %14, %cst_21 {dimension_numbers = #tpu.dot_dimension_numbers<[1], [0], [0], [1], [0, 0, 1, 1], [], []>} : vector<16x16xf32>, vector<16x16xf32>, vector<16x16xf32> -> vector<16x16xf32>
    %16 = arith.addf %7, %15 : vector<16x16xf32>
    %c1_22 = arith.constant 1 : index
    %c0_23 = arith.constant 0 : index
    %17 = vector.load %arg5[%c1_22, %c0_23] : memref<24x16xf32, #tpu.memory_space<vmem>>, vector<16x16xf32>
    %c0_24 = arith.constant 0 : index
    %c0_25 = arith.constant 0 : index
    %c1_26 = arith.constant 1 : index
    %c0_27 = arith.constant 0 : index
    %c0_28 = arith.constant 0 : index
    %18 = vector.load %arg3[%c0_24, %c0_25, %c1_26, %c0_27, %c0_28] : memref<1x2x9x16x16xf32, #tpu.memory_space<vmem>>, vector<1x1x1x16x16xf32>
    %19 = vector.shape_cast %18 : vector<1x1x1x16x16xf32> to vector<16x16xf32>
    %cst_29 = arith.constant dense<0.000000e+00> : vector<16x16xf32>
    %20 = tpu.matmul %17, %19, %cst_29 {dimension_numbers = #tpu.dot_dimension_numbers<[1], [0], [0], [1], [0, 0, 1, 1], [], []>} : vector<16x16xf32>, vector<16x16xf32>, vector<16x16xf32> -> vector<16x16xf32>
    %21 = arith.addf %12, %20 : vector<16x16xf32>
    %c0_30 = arith.constant 0 : index
    %c1_31 = arith.constant 1 : index
    %c1_32 = arith.constant 1 : index
    %c0_33 = arith.constant 0 : index
    %c0_34 = arith.constant 0 : index
    %22 = vector.load %arg3[%c0_30, %c1_31, %c1_32, %c0_33, %c0_34] : memref<1x2x9x16x16xf32, #tpu.memory_space<vmem>>, vector<1x1x1x16x16xf32>
    %23 = vector.shape_cast %22 : vector<1x1x1x16x16xf32> to vector<16x16xf32>
    %cst_35 = arith.constant dense<0.000000e+00> : vector<16x16xf32>
    %24 = tpu.matmul %17, %23, %cst_35 {dimension_numbers = #tpu.dot_dimension_numbers<[1], [0], [0], [1], [0, 0, 1, 1], [], []>} : vector<16x16xf32>, vector<16x16xf32>, vector<16x16xf32> -> vector<16x16xf32>
    %25 = arith.addf %16, %24 : vector<16x16xf32>
    %c2 = arith.constant 2 : index
    %c0_36 = arith.constant 0 : index
    %26 = vector.load %arg5[%c2, %c0_36] : memref<24x16xf32, #tpu.memory_space<vmem>>, vector<16x16xf32>
    %c0_37 = arith.constant 0 : index
    %c0_38 = arith.constant 0 : index
    %c2_39 = arith.constant 2 : index
    %c0_40 = arith.constant 0 : index
    %c0_41 = arith.constant 0 : index
    %27 = vector.load %arg3[%c0_37, %c0_38, %c2_39, %c0_40, %c0_41] : memref<1x2x9x16x16xf32, #tpu.memory_space<vmem>>, vector<1x1x1x16x16xf32>
    %28 = vector.shape_cast %27 : vector<1x1x1x16x16xf32> to vector<16x16xf32>
    %cst_42 = arith.constant dense<0.000000e+00> : vector<16x16xf32>
    %29 = tpu.matmul %26, %28, %cst_42 {dimension_numbers = #tpu.dot_dimension_numbers<[1], [0], [0], [1], [0, 0, 1, 1], [], []>} : vector<16x16xf32>, vector<16x16xf32>, vector<16x16xf32> -> vector<16x16xf32>
    %30 = arith.addf %21, %29 : vector<16x16xf32>
    %c0_43 = arith.constant 0 : index
    %c1_44 = arith.constant 1 : index
    %c2_45 = arith.constant 2 : index
    %c0_46 = arith.constant 0 : index
    %c0_47 = arith.constant 0 : index
    %31 = vector.load %arg3[%c0_43, %c1_44, %c2_45, %c0_46, %c0_47] : memref<1x2x9x16x16xf32, #tpu.memory_space<vmem>>, vector<1x1x1x16x16xf32>
    %32 = vector.shape_cast %31 : vector<1x1x1x16x16xf32> to vector<16x16xf32>
    %cst_48 = arith.constant dense<0.000000e+00> : vector<16x16xf32>
    %33 = tpu.matmul %26, %32, %cst_48 {dimension_numbers = #tpu.dot_dimension_numbers<[1], [0], [0], [1], [0, 0, 1, 1], [], []>} : vector<16x16xf32>, vector<16x16xf32>, vector<16x16xf32> -> vector<16x16xf32>
    %34 = arith.addf %25, %33 : vector<16x16xf32>
    %c3 = arith.constant 3 : index
    %c0_49 = arith.constant 0 : index
    %35 = vector.load %arg5[%c3, %c0_49] : memref<24x16xf32, #tpu.memory_space<vmem>>, vector<16x16xf32>
    %c0_50 = arith.constant 0 : index
    %c0_51 = arith.constant 0 : index
    %c3_52 = arith.constant 3 : index
    %c0_53 = arith.constant 0 : index
    %c0_54 = arith.constant 0 : index
    %36 = vector.load %arg3[%c0_50, %c0_51, %c3_52, %c0_53, %c0_54] : memref<1x2x9x16x16xf32, #tpu.memory_space<vmem>>, vector<1x1x1x16x16xf32>
    %37 = vector.shape_cast %36 : vector<1x1x1x16x16xf32> to vector<16x16xf32>
    %cst_55 = arith.constant dense<0.000000e+00> : vector<16x16xf32>
    %38 = tpu.matmul %35, %37, %cst_55 {dimension_numbers = #tpu.dot_dimension_numbers<[1], [0], [0], [1], [0, 0, 1, 1], [], []>} : vector<16x16xf32>, vector<16x16xf32>, vector<16x16xf32> -> vector<16x16xf32>
    %39 = arith.addf %30, %38 : vector<16x16xf32>
    %c0_56 = arith.constant 0 : index
    %c1_57 = arith.constant 1 : index
    %c3_58 = arith.constant 3 : index
    %c0_59 = arith.constant 0 : index
    %c0_60 = arith.constant 0 : index
    %40 = vector.load %arg3[%c0_56, %c1_57, %c3_58, %c0_59, %c0_60] : memref<1x2x9x16x16xf32, #tpu.memory_space<vmem>>, vector<1x1x1x16x16xf32>
    %41 = vector.shape_cast %40 : vector<1x1x1x16x16xf32> to vector<16x16xf32>
    %cst_61 = arith.constant dense<0.000000e+00> : vector<16x16xf32>
    %42 = tpu.matmul %35, %41, %cst_61 {dimension_numbers = #tpu.dot_dimension_numbers<[1], [0], [0], [1], [0, 0, 1, 1], [], []>} : vector<16x16xf32>, vector<16x16xf32>, vector<16x16xf32> -> vector<16x16xf32>
    %43 = arith.addf %34, %42 : vector<16x16xf32>
    %c4_62 = arith.constant 4 : index
    %c0_63 = arith.constant 0 : index
    %44 = vector.load %arg5[%c4_62, %c0_63] : memref<24x16xf32, #tpu.memory_space<vmem>>, vector<16x16xf32>
    %c0_64 = arith.constant 0 : index
    %c0_65 = arith.constant 0 : index
    %c4_66 = arith.constant 4 : index
    %c0_67 = arith.constant 0 : index
    %c0_68 = arith.constant 0 : index
    %45 = vector.load %arg3[%c0_64, %c0_65, %c4_66, %c0_67, %c0_68] : memref<1x2x9x16x16xf32, #tpu.memory_space<vmem>>, vector<1x1x1x16x16xf32>
    %46 = vector.shape_cast %45 : vector<1x1x1x16x16xf32> to vector<16x16xf32>
    %cst_69 = arith.constant dense<0.000000e+00> : vector<16x16xf32>
    %47 = tpu.matmul %44, %46, %cst_69 {dimension_numbers = #tpu.dot_dimension_numbers<[1], [0], [0], [1], [0, 0, 1, 1], [], []>} : vector<16x16xf32>, vector<16x16xf32>, vector<16x16xf32> -> vector<16x16xf32>
    %48 = arith.addf %39, %47 : vector<16x16xf32>
    %c0_70 = arith.constant 0 : index
    %c1_71 = arith.constant 1 : index
    %c4_72 = arith.constant 4 : index
    %c0_73 = arith.constant 0 : index
    %c0_74 = arith.constant 0 : index
    %49 = vector.load %arg3[%c0_70, %c1_71, %c4_72, %c0_73, %c0_74] : memref<1x2x9x16x16xf32, #tpu.memory_space<vmem>>, vector<1x1x1x16x16xf32>
    %50 = vector.shape_cast %49 : vector<1x1x1x16x16xf32> to vector<16x16xf32>
    %cst_75 = arith.constant dense<0.000000e+00> : vector<16x16xf32>
    %51 = tpu.matmul %44, %50, %cst_75 {dimension_numbers = #tpu.dot_dimension_numbers<[1], [0], [0], [1], [0, 0, 1, 1], [], []>} : vector<16x16xf32>, vector<16x16xf32>, vector<16x16xf32> -> vector<16x16xf32>
    %52 = arith.addf %43, %51 : vector<16x16xf32>
    %c5 = arith.constant 5 : index
    %c0_76 = arith.constant 0 : index
    %53 = vector.load %arg5[%c5, %c0_76] : memref<24x16xf32, #tpu.memory_space<vmem>>, vector<16x16xf32>
    %c0_77 = arith.constant 0 : index
    %c0_78 = arith.constant 0 : index
    %c5_79 = arith.constant 5 : index
    %c0_80 = arith.constant 0 : index
    %c0_81 = arith.constant 0 : index
    %54 = vector.load %arg3[%c0_77, %c0_78, %c5_79, %c0_80, %c0_81] : memref<1x2x9x16x16xf32, #tpu.memory_space<vmem>>, vector<1x1x1x16x16xf32>
    %55 = vector.shape_cast %54 : vector<1x1x1x16x16xf32> to vector<16x16xf32>
    %cst_82 = arith.constant dense<0.000000e+00> : vector<16x16xf32>
    %56 = tpu.matmul %53, %55, %cst_82 {dimension_numbers = #tpu.dot_dimension_numbers<[1], [0], [0], [1], [0, 0, 1, 1], [], []>} : vector<16x16xf32>, vector<16x16xf32>, vector<16x16xf32> -> vector<16x16xf32>
    %57 = arith.addf %48, %56 : vector<16x16xf32>
    %c0_83 = arith.constant 0 : index
    %c1_84 = arith.constant 1 : index
    %c5_85 = arith.constant 5 : index
    %c0_86 = arith.constant 0 : index
    %c0_87 = arith.constant 0 : index
    %58 = vector.load %arg3[%c0_83, %c1_84, %c5_85, %c0_86, %c0_87] : memref<1x2x9x16x16xf32, #tpu.memory_space<vmem>>, vector<1x1x1x16x16xf32>
    %59 = vector.shape_cast %58 : vector<1x1x1x16x16xf32> to vector<16x16xf32>
    %cst_88 = arith.constant dense<0.000000e+00> : vector<16x16xf32>
    %60 = tpu.matmul %53, %59, %cst_88 {dimension_numbers = #tpu.dot_dimension_numbers<[1], [0], [0], [1], [0, 0, 1, 1], [], []>} : vector<16x16xf32>, vector<16x16xf32>, vector<16x16xf32> -> vector<16x16xf32>
    %61 = arith.addf %52, %60 : vector<16x16xf32>
    %c6 = arith.constant 6 : index
    %c0_89 = arith.constant 0 : index
    %62 = vector.load %arg5[%c6, %c0_89] : memref<24x16xf32, #tpu.memory_space<vmem>>, vector<16x16xf32>
    %c0_90 = arith.constant 0 : index
    %c0_91 = arith.constant 0 : index
    %c6_92 = arith.constant 6 : index
    %c0_93 = arith.constant 0 : index
    %c0_94 = arith.constant 0 : index
    %63 = vector.load %arg3[%c0_90, %c0_91, %c6_92, %c0_93, %c0_94] : memref<1x2x9x16x16xf32, #tpu.memory_space<vmem>>, vector<1x1x1x16x16xf32>
    %64 = vector.shape_cast %63 : vector<1x1x1x16x16xf32> to vector<16x16xf32>
    %cst_95 = arith.constant dense<0.000000e+00> : vector<16x16xf32>
    %65 = tpu.matmul %62, %64, %cst_95 {dimension_numbers = #tpu.dot_dimension_numbers<[1], [0], [0], [1], [0, 0, 1, 1], [], []>} : vector<16x16xf32>, vector<16x16xf32>, vector<16x16xf32> -> vector<16x16xf32>
    %66 = arith.addf %57, %65 : vector<16x16xf32>
    %c0_96 = arith.constant 0 : index
    %c1_97 = arith.constant 1 : index
    %c6_98 = arith.constant 6 : index
    %c0_99 = arith.constant 0 : index
    %c0_100 = arith.constant 0 : index
    %67 = vector.load %arg3[%c0_96, %c1_97, %c6_98, %c0_99, %c0_100] : memref<1x2x9x16x16xf32, #tpu.memory_space<vmem>>, vector<1x1x1x16x16xf32>
    %68 = vector.shape_cast %67 : vector<1x1x1x16x16xf32> to vector<16x16xf32>
    %cst_101 = arith.constant dense<0.000000e+00> : vector<16x16xf32>
    %69 = tpu.matmul %62, %68, %cst_101 {dimension_numbers = #tpu.dot_dimension_numbers<[1], [0], [0], [1], [0, 0, 1, 1], [], []>} : vector<16x16xf32>, vector<16x16xf32>, vector<16x16xf32> -> vector<16x16xf32>
    %70 = arith.addf %61, %69 : vector<16x16xf32>
    %c7 = arith.constant 7 : index
    %c0_102 = arith.constant 0 : index
    %71 = vector.load %arg5[%c7, %c0_102] : memref<24x16xf32, #tpu.memory_space<vmem>>, vector<16x16xf32>
    %c0_103 = arith.constant 0 : index
    %c0_104 = arith.constant 0 : index
    %c7_105 = arith.constant 7 : index
    %c0_106 = arith.constant 0 : index
    %c0_107 = arith.constant 0 : index
    %72 = vector.load %arg3[%c0_103, %c0_104, %c7_105, %c0_106, %c0_107] : memref<1x2x9x16x16xf32, #tpu.memory_space<vmem>>, vector<1x1x1x16x16xf32>
    %73 = vector.shape_cast %72 : vector<1x1x1x16x16xf32> to vector<16x16xf32>
    %cst_108 = arith.constant dense<0.000000e+00> : vector<16x16xf32>
    %74 = tpu.matmul %71, %73, %cst_108 {dimension_numbers = #tpu.dot_dimension_numbers<[1], [0], [0], [1], [0, 0, 1, 1], [], []>} : vector<16x16xf32>, vector<16x16xf32>, vector<16x16xf32> -> vector<16x16xf32>
    %75 = arith.addf %66, %74 : vector<16x16xf32>
    %c0_109 = arith.constant 0 : index
    %c1_110 = arith.constant 1 : index
    %c7_111 = arith.constant 7 : index
    %c0_112 = arith.constant 0 : index
    %c0_113 = arith.constant 0 : index
    %76 = vector.load %arg3[%c0_109, %c1_110, %c7_111, %c0_112, %c0_113] : memref<1x2x9x16x16xf32, #tpu.memory_space<vmem>>, vector<1x1x1x16x16xf32>
    %77 = vector.shape_cast %76 : vector<1x1x1x16x16xf32> to vector<16x16xf32>
    %cst_114 = arith.constant dense<0.000000e+00> : vector<16x16xf32>
    %78 = tpu.matmul %71, %77, %cst_114 {dimension_numbers = #tpu.dot_dimension_numbers<[1], [0], [0], [1], [0, 0, 1, 1], [], []>} : vector<16x16xf32>, vector<16x16xf32>, vector<16x16xf32> -> vector<16x16xf32>
    %79 = arith.addf %70, %78 : vector<16x16xf32>
    %c8 = arith.constant 8 : index
    %c0_115 = arith.constant 0 : index
    %80 = vector.load %arg5[%c8, %c0_115] : memref<24x16xf32, #tpu.memory_space<vmem>>, vector<16x16xf32>
    %c0_116 = arith.constant 0 : index
    %c0_117 = arith.constant 0 : index
    %c8_118 = arith.constant 8 : index
    %c0_119 = arith.constant 0 : index
    %c0_120 = arith.constant 0 : index
    %81 = vector.load %arg3[%c0_116, %c0_117, %c8_118, %c0_119, %c0_120] : memref<1x2x9x16x16xf32, #tpu.memory_space<vmem>>, vector<1x1x1x16x16xf32>
    %82 = vector.shape_cast %81 : vector<1x1x1x16x16xf32> to vector<16x16xf32>
    %cst_121 = arith.constant dense<0.000000e+00> : vector<16x16xf32>
    %83 = tpu.matmul %80, %82, %cst_121 {dimension_numbers = #tpu.dot_dimension_numbers<[1], [0], [0], [1], [0, 0, 1, 1], [], []>} : vector<16x16xf32>, vector<16x16xf32>, vector<16x16xf32> -> vector<16x16xf32>
    %84 = arith.addf %75, %83 : vector<16x16xf32>
    %c0_122 = arith.constant 0 : index
    %c1_123 = arith.constant 1 : index
    %c8_124 = arith.constant 8 : index
    %c0_125 = arith.constant 0 : index
    %c0_126 = arith.constant 0 : index
    %85 = vector.load %arg3[%c0_122, %c1_123, %c8_124, %c0_125, %c0_126] : memref<1x2x9x16x16xf32, #tpu.memory_space<vmem>>, vector<1x1x1x16x16xf32>
    %86 = vector.shape_cast %85 : vector<1x1x1x16x16xf32> to vector<16x16xf32>
    %cst_127 = arith.constant dense<0.000000e+00> : vector<16x16xf32>
    %87 = tpu.matmul %80, %86, %cst_127 {dimension_numbers = #tpu.dot_dimension_numbers<[1], [0], [0], [1], [0, 0, 1, 1], [], []>} : vector<16x16xf32>, vector<16x16xf32>, vector<16x16xf32> -> vector<16x16xf32>
    %88 = arith.addf %79, %87 : vector<16x16xf32>
    %c0_128 = arith.constant 0 : index
    %c0_129 = arith.constant 0 : index
    %c0_130 = arith.constant 0 : index
    %c0_131 = arith.constant 0 : index
    %89 = vector.load %arg4[%c0_128, %c0_129, %c0_130, %c0_131] : memref<1x2x16x16xf32, #tpu.memory_space<vmem>>, vector<1x1x16x16xf32>
    %90 = vector.shape_cast %89 : vector<1x1x16x16xf32> to vector<16x16xf32>
    %91 = vector.shape_cast %84 : vector<16x16xf32> to vector<1x1x16x16xf32>
    tpu.vector_store %arg4[%c0_128, %c0_129, %c0_130, %c0_131], %91 {strides = array<i32>} : memref<1x2x16x16xf32, #tpu.memory_space<vmem>>, vector<1x1x16x16xf32>,
    %c0_132 = arith.constant 0 : index
    %c1_133 = arith.constant 1 : index
    %c0_134 = arith.constant 0 : index
    %c0_135 = arith.constant 0 : index
    %92 = vector.load %arg4[%c0_132, %c1_133, %c0_134, %c0_135] : memref<1x2x16x16xf32, #tpu.memory_space<vmem>>, vector<1x1x16x16xf32>
    %93 = vector.shape_cast %92 : vector<1x1x16x16xf32> to vector<16x16xf32>
    %94 = vector.shape_cast %88 : vector<16x16xf32> to vector<1x1x16x16xf32>
    tpu.vector_store %arg4[%c0_132, %c1_133, %c0_134, %c0_135], %94 {strides = array<i32>} : memref<1x2x16x16xf32, #tpu.memory_space<vmem>>, vector<1x1x16x16xf32>,
    return
  }
  func.func @transform_0(%arg0: i32, %arg1: i32) -> (i32, i32, i32, i32) {
    %c0_i32 = arith.constant 0 : i32
    %c0_i32_0 = arith.constant 0 : i32
    %c0_i32_1 = arith.constant 0 : i32
    return %arg0, %arg1, %c0_i32, %c0_i32_0 : i32, i32, i32, i32
  }
  func.func @transform_1(%arg0: i32, %arg1: i32) -> (i32, i32, i32, i32, i32) {
    %c0_i32 = arith.constant 0 : i32
    %c0_i32_0 = arith.constant 0 : i32
    %c0_i32_1 = arith.constant 0 : i32
    %c0_i32_2 = arith.constant 0 : i32
    %c0_i32_3 = arith.constant 0 : i32
    return %arg1, %c0_i32, %c0_i32_0, %c0_i32_1, %c0_i32_2 : i32, i32, i32, i32, i32
  }
  func.func @transform_2(%arg0: i32, %arg1: i32) -> (i32, i32, i32, i32) {
    %c0_i32 = arith.constant 0 : i32
    %c0_i32_0 = arith.constant 0 : i32
    %c0_i32_1 = arith.constant 0 : i32
    return %arg0, %arg1, %c0_i32, %c0_i32_0 : i32, i32, i32, i32
  }
}

</mosaic_0001>

<bundles_post_ra>
// kernel: tpu_custom_call.1
= control target key start
LH: loop header
LB: loop body
LE: loop exit
PB: predicated region body
PF: predicated region fallthrough
CT: control target
= control target key end

     0   :  { %s2993_s0 = inlined_call_operand.hbm [shape: f32[2,4,16,16], index: 0, kind: input, shape index: {}]   ;;  %s2994_s1 = inlined_call_operand.hbm [shape: f32[4,2,9,16,16], index: 1, kind: input, shape index: {}]   ;;  %s2995_s2 = inlined_call_operand.hbm [shape: f32[2,8,16,16], index: 2, kind: output, shape index: {}]  }
   0x1   :  { %3007 = sst [smem:[#allocation15_spill]] %s2995_s2 }
   0x2   :  { %7 = vsyncpa [#allocation4], 0 }
   0x3   :  { %9 = vsyncpa [#allocation4 + $0x1], 0 }
   0x4   :  { %10 = vsyncpa [#allocation7], 0 }
   0x5   :  { %12 = vsyncpa [#allocation7 + $0x1], 0 }
   0x6   :  { %13 = vsyncpa [#allocation5], 0 }
   0x7   :  { %15 = vsyncpa [#allocation5 + $0x1], 0  ;;  %s2587_s9 = smov 0   ;;  %s2589_s10 = smov 0  }
   0x8   :  { %s2591_s11 = smov 0   ;;  %s2593_s12 = smov 0  }
   0x9   :  { %s2595_s13 = smov 0   ;;  %s2597_s14 = smov 0  }
   0xa   :  { %s2599_s15 = smov 0   ;;  %s2601_s16 = smov 0  }
   0xb   :  { %s2603_s17 = smov 0   ;;  %s2605_s18 = smov 0  }
   0xc   :  { %s2607_s19 = smov 0  }
   0xd LB: > { %3008 = sst [smem:[#allocation12_spill]] %s2534_s12  ;;  %s1867_s20 = sadd.s32 4294967295, %s2562_s19   ;;  %s2562_s19 = sphi %s2607_s19, %s21_s19   ;;  %s2558_s18 = sphi %s2605_s18, %s3043_s18   ;;  %s2554_s17 = sphi %s2603_s17, %s3042_s17   ;;  %s2550_s16 = sphi %s2601_s16, %s3041_s16   ;;  %s2546_s15 = sphi %s2599_s15, %s3040_s15   ;;  %s2542_s14 = sphi %s2597_s14, %s3039_s14   ;;  %s2538_s13 = sphi %s2595_s13, %s3038_s13   ;;  %s2534_s12 = sphi %s2593_s12, %s3037_s12   ;;  %s2530_s11 = sphi %s2591_s11, %s3036_s11   ;;  %s2526_s10 = sphi %s2589_s10, %s3035_s10   ;;  %s2522_s9 = sphi %s2587_s9, %s3034_s9  }
   0xe   : > { %s1868_s21 = sadd.s32 4294967294, %s2562_s19   ;;  %s30_s22 = sadd.s32 1, %s2554_s17 }
   0xf   : > { %s33_s23 = sadd.s32 1, %s2558_s18  ;;  %p31_p0 = scmp.ge.s32.totalorder %s30_s22, 4 }
  0x10   : > { %s42_s24 = sadd.s32 1, %s2542_s14  ;;  %p49_p1 = scmp.ne.s32.totalorder %s2542_s14, %s2538_s13 }
  0x11   : > { %p3001_p2 = scmp.eq.s32.totalorder %s2562_s19, 0  ;;  %s3045_s22 = smov (%p31_p0, %s30_s22), 0 }
  0x12   : > { %3009 = sst [smem:[#allocation13_spill]] %s3045_s22  ;;  %s3047_s23 = smov (!%p31_p0, %s33_s23), %s2558_s18 }
  0x13   : > { %s2655_s25 = ssub.s32 %s2554_s17, %s3045_s22  ;;  %p2662_p3 = por %p3001_p2, %p49_p1 }
  0x14   : > { %p35_p4 = scmp.ge.s32.totalorder %s3047_s23, 2  ;;  %p55_p5 = scmp.ne.s32.totalorder %s2538_s13, %s2534_s12 }
  0x15   : > { %p2668_p6 = scmp.eq.s32.totalorder %s1867_s20, 0  ;;  %p107_p9 = scmp.eq.s32.totalorder %s1867_s20, 7 }
  0x16   : > { %s3049_s23 = smov (%p35_p4, %s3047_s23), 0  ;;  %p113_p10 = scmp.eq.s32.totalorder %s1868_s21, 7 }
  0x17   : > { %3012 = sst [smem:[#allocation14_spill]] %s3049_s23  ;;  %p2677_p8 = por %p2668_p6, %p55_p5 }
  0x18   : > { %s37_s29 = ssub.s32 %s2558_s18, %s3049_s23  ;;  %p2687_p11 = por %p107_p9, %p49_p1 }
  0x19   : > { %s3013_s28 = scalar_select %p2677_p8, 1, 0 }
  0x1a   : > { %s39_s30 = sor.u32 %s2655_s25, %s37_s29  ;;  %p2691_p13 = por %p113_p10, %p55_p5 }
  0x1b   : > { %s3014_s3 = scalar_select %p2687_p11, 1, 0 }
  0x1c   : > { %p40_p12 = scmp.eq.s32.totalorder %s39_s30, 0  ;;  %p3000_p0 = scmp.lt.s32.totalorder %s2562_s19, 8 }
  0x1d   : > { %s3015_s4 = scalar_select %p2691_p13, 1, 0 }
  0x1e   : > { %s2697_s5 = scalar_select %p40_p12, %s2542_s14, %s42_s24  }
  0x1f   : > { %s133_s6 = sand.u32 1, %s2542_s14   ;;  %s1872_s7 = sshll.u32 %s2554_s17, 1 }
  0x20   : > { %s1871_s8 = sshll.u32 %s133_s6, 4  ;;  %s1873_s20 = sshll.u32 %s2558_s18, 3 }
  0x21   : > { %s143_s21 = sadd.s32 %s1873_s20, %s1872_s7  ;;  %s137_s29 = scalar_lea.vmem [#allocation3], %s1871_s8 }
  0x22   : > { %s146_s23 = sshll.u32 %s137_s29, 4  ;;  %s1874_s22 = sshll.u32 %s143_s21, 7  ;;  %s2702_s23 = int_to_ptr.vmem [resolvable:$true] %s146_s23 }
  0x23   : > { %s2707_s30 = scalar_lea.hbm %s2993_s0, %s1874_s22  ;;  %p2713_p1 = pnand %p3000_p0, %p2662_p3 }
  0x24   : > { %s2718_s7 = scalar_lea.sflag [#allocation4], %s133_s6  ;;  %s2376_s8 = scalar_lea.hbm %s2707_s30, 256 }
  0x25   : > { %p2377_p5 = scmp.ne.s32.totalorder %s2707_s30, %s2376_s8  ;;  %p2378_p9 = pneg %p2713_p1 }
  0x26   : > { %s2381_s22 = scalar_lea.hbm %s2993_s0, 2048  ;;  %p2382_p3 = scmp.lt.u32.totalorder %s2707_s30, %s2993_s0 }
  0x27   : > { %p2379_p10 = pnand %p2378_p9, %p2377_p5  ;;  %p2383_p0 = scmp.lt.u32.totalorder %s2381_s22, %s2376_s8 }
  0x28   : > { %p2385_p7 = scmp.lt.u32.totalorder %s2376_s8, %s2707_s30 }
  0x29   : > { %p2380_p12 = pneg %p2379_p10  ;;  %p2384_p2 = por %p2383_p0, %p2382_p3 }
  0x2b   : > { %p2386_p4 = por %p2385_p7, %p2384_p2 }
  0x2d   : > { %p2387_p13 = pnand %p2386_p4, %p2380_p12 }
  0x2f   : > { %2390 = shalt.err (!%p2387_p13)
}
  0x30   : > { %s2391_s6 = scalar_lea.vmem %s2702_s23, 256  ;;  %s2564_s21 = smov [#allocation3]  }
  0x31   : > { %p2392_p5 = scmp.ne.s32.totalorder %s2702_s23, %s2391_s6  ;;  %s2396_s29 = sshll.u32 %s2564_s21, 4  ;;  %s2397_s29 = int_to_ptr.vmem [resolvable:$false] %s2396_s29 }
  0x32   : > { %s2398_s2 = scalar_lea.vmem %s2397_s29, 512  ;;  %p2399_p8 = scmp.lt.s32.totalorder %s2702_s23, %s2397_s29 }
  0x33   : > { %p2394_p10 = pnand %p2392_p5, %p2378_p9  ;;  %p2400_p0 = scmp.lt.s32.totalorder %s2398_s2, %s2391_s6 }
  0x35   : > { %p2395_p11 = pneg %p2394_p10  ;;  %p2401_p3 = por %p2400_p0, %p2399_p8 }
  0x37   : > { %p2402_p2 = pnand %p2401_p3, %p2395_p11 }
  0x39   : > { %2405 = shalt.err (!%p2402_p2)
}
  0x3a   : > { %s3004_s8 = smov 128   ;;  %s3005_s12 = smov 8  }
  0x3b   : > { %2273 = dma.hbm_to_vmem [thread:$0]  (!%p2713_p1), %s2707_s30, 256, %s2702_s23, %s2718_s7, %s3004_s8, %s3004_s8, %s3005_s12  }
  0x3c   : > { %p175_p7 = scmp.lt.s32.totalorder %s2562_s19, 9  ;;  %p3017_p8 = scmp.ge.s32.totalorder %s2562_s19, 1 }
  0x3d   : > { %s68_s26 = sadd.s32 1, %s2530_s11  ;;  %p75_p13 = scmp.ne.s32.totalorder %s2530_s11, %s2526_s10 }
  0x3e   : > { %p2752_p11 = pnand %p3017_p8, %p175_p7  ;;  %p3019_p4 = scmp.eq.s32.totalorder %s2655_s25, 0 }
  0x3f   : > { %p3020_p9 = scmp.eq.s32.totalorder %s2562_s19, 0  ;;  %p81_p5 = scmp.ne.s32.totalorder %s2526_s10, %s2522_s9 }
  0x40   : > { %s2762_s20 = scalar_select %p3019_p4, %s2530_s11, %s68_s26  }
  0x41   : > { %p77_p12 = por %p75_p13, %p3020_p9  ;;  %s156_s6 = sand.u32 1, %s2530_s11  }
  0x42   : > { %s2262_s24 = smul.u32 4608, %s2554_s17  ;;  %p2772_p10 = por %p81_p5, %p2668_p6 }
  0x43   : > { %s2261_s23 = smul.u32 288, %s156_s6  ;;  %p3022_p1 = scmp.lt.s32.totalorder %s2562_s19, 8 }
  0x44   : > { %s3021_s21 = scalar_select %p2772_p10, 1, 0 }
  0x45   : > { %p2778_p0 = pnand %p3022_p1, %p77_p12  ;;  %s2785_s29 = scalar_lea.hbm %s2994_s1, %s2262_s24 }
  0x46   : > { %s160_s9 = scalar_lea.vmem [#allocation6], %s2261_s23  ;;  %s2789_s2 = scalar_lea.sflag [#allocation7], %s156_s6 }
  0x47   : > { %s167_s27 = sshll.u32 %s160_s9, 4  ;;  %s2406_s26 = scalar_lea.hbm %s2785_s29, 4608  ;;  %s2787_s27 = int_to_ptr.vmem [resolvable:$true] %s167_s27 }
  0x48   : > { %p2407_p6 = scmp.ne.s32.totalorder %s2785_s29, %s2406_s26  ;;  %p2408_p3 = pneg %p2778_p0 }
  0x49   : > { %s2411_s25 = scalar_lea.hbm %s2994_s1, 18432  ;;  %p2412_p8 = scmp.lt.u32.totalorder %s2785_s29, %s2994_s1 }
  0x4a   : > { %p2409_p2 = pnand %p2408_p3, %p2407_p6  ;;  %p2413_p13 = scmp.lt.u32.totalorder %s2411_s25, %s2406_s26 }
  0x4b   : > { %p2415_p9 = scmp.lt.u32.totalorder %s2406_s26, %s2785_s29 }
  0x4c   : > { %p2410_p7 = pneg %p2409_p2  ;;  %p2414_p4 = por %p2413_p13, %p2412_p8 }
  0x4e   : > { %p2416_p12 = por %p2415_p9, %p2414_p4 }
  0x50   : > { %p2417_p5 = pnand %p2416_p12, %p2410_p7 }
  0x52   : > { %2420 = shalt.err (!%p2417_p5)
}
  0x53   : > { %s2421_s6 = scalar_lea.vmem %s2787_s27, 4608  ;;  %s2567_s23 = smov [#allocation6]  }
  0x54   : > { %p2422_p1 = scmp.ne.s32.totalorder %s2787_s27, %s2421_s6  ;;  %s2426_s9 = sshll.u32 %s2567_s23, 4  ;;  %s2427_s9 = int_to_ptr.vmem [resolvable:$false] %s2426_s9 }
  0x55   : > { %s2428_s8 = scalar_lea.vmem %s2427_s9, 9216  ;;  %p2429_p10 = scmp.lt.s32.totalorder %s2787_s27, %s2427_s9 }
  0x56   : > { %p2424_p6 = pnand %p2422_p1, %p2408_p3  ;;  %p2430_p8 = scmp.lt.s32.totalorder %s2428_s8, %s2421_s6 }
  0x58   : > { %p2425_p2 = pneg %p2424_p6  ;;  %p2431_p13 = por %p2430_p8, %p2429_p10 }
  0x5a   : > { %p2432_p4 = pnand %p2431_p13, %p2425_p2 }
  0x5c   : > { %2435 = shalt.err (!%p2432_p4)
}
  0x5d   : > { %s3024_s12 = smov 8   ;;  %s3025_s26 = smov 128  }
  0x5e   : > { %2276 = dma.hbm_to_vmem [thread:$0]  (!%p2778_p0), %s2785_s29, 4608, %s2787_s27, %s2789_s2, %s3025_s26, %s3025_s26, %s3024_s12  }
  0x5f   : > { %179 = sbr.rel (%p2752_p11) target bundleno = 412 (0x19c), region = 28  ;;  %s2823_s24 = sand.u32 (!%p2752_p11), 1, %s2538_s13  }
  0x60   : > { %s1877_s7 = sshll.u32 (!%p2752_p11), %s2823_s24, 4  ;;  %s182_s25 = scalar_lea.sflag (!%p2752_p11), [#allocation4], %s2823_s24 }
  0x61   : > { %s185_s6 = scalar_lea.vmem (!%p2752_p11), [#allocation3], %s1877_s7  ;;  %p3026_p10 = scmp.ne.s32.totalorder (!%p2752_p11), %s3013_s28, 0 }
  0x66   : > { %2509 = dma.done.wait (%p3026_p10), %s182_s25, 256  }
  0x67   : > { %2511 = vsyncadd (%p3026_p10), %s182_s25, 4294967040  ;;  %s190_s30 = sand.u32 1, %s2526_s10   ;;  %p3027_p11 = scmp.ne.s32.totalorder %s3021_s21, 0 }
  0x68   : > { %s2263_s29 = smul.u32 288, %s190_s30  ;;  %s191_s22 = scalar_lea.sflag [#allocation7], %s190_s30 }
  0x6a   : > { %s2832_s27 = scalar_lea.vmem [#allocation6], %s2263_s29 }
  0x6b   : > { %2513 = dma.done.wait (%p3027_p11), %s191_s22, 4608  }
  0x6c   : > { %2515 = vsyncadd (%p3027_p11), %s191_s22, 4294962688  ;;  %vm221_vm0 = vcmask 125952   ;;  %v2568_v0 = vmov 0.0   ;;  %vm226_vm1 = vcmask 130048   ;;  %v1881_v1 = vld [vmem:[%s2832_s27 + $0x10] sm:$0xff]  ;;  %v1882_v2 = vld [vmem:[%s2832_s27 + $0x18] sm:$0xff] }
  0x6d   : > { %222 = vst.msk [vmem:[#allocation2] sm:$0xf] %vm221_vm0, %v2568_v0  ;;  %223 = vst.msk [vmem:[#allocation2 + $0x14] sm:$0xf] %vm221_vm0, %v2568_v0  ;;  %v1887_v3 = vld [vmem:[%s2832_s27 + $0xa0] sm:$0xff]  ;;  %v2157_v4 = vpack.c.bf16 %v1882_v2, %v1881_v1  ;;  %v1888_v5 = vld [vmem:[%s2832_s27 + $0xa8] sm:$0xff] }
  0x6e   : > { %v224_v6 = vld [vmem:[%s185_s6] sm:$0xff]  ;;  %v2165_v8 = vpack.c.bf16 %v1888_v5, %v1887_v3  ;;  %v232_v9 = vld [vmem:[%s2832_s27 + $0x8] sm:$0xff]  ;;  %v1880_v11 = vld [vmem:[%s2832_s27 + $0x98] sm:$0xff]  ;;  %s1878_s28 = sshll.u32 %s2823_s24, 5  ;;  %s1958_s21 = sshll.u32 %s2546_s15, 2 }
  0x6f   : > { %v231_v7 = vld [vmem:[%s2832_s27] sm:$0xff]  ;;  %227 = vst.msk [vmem:[#allocation2 + $0x4] sm:$0xff] %vm226_vm1, %v224_v6  ;;  %v1879_v10 = vld [vmem:[%s2832_s27 + $0x90] sm:$0xff]  ;;  %2158 = vmatprep.subr.bf16.mxu0 %v2157_v4  ;;  %v225_v14 = vld [vmem:[%s185_s6 + $0x8] sm:$0xff]  ;;  %s1954_s2 = sshll.u32 %s2550_s16, 4  ;;  %s219_s9 = scalar_lea.vmem [#allocation8], %s1878_s28 }
  0x70   : > { %v2161_v12 = vpack.c.bf16 %v232_v9, %v231_v7  ;;  %v2169_v13 = vpack.c.bf16 %v1880_v11, %v1879_v10  ;;  %2166 = vmatprep.subr.bf16.mxu1 %v2165_v8  ;;  %2160 = vmatpush3.bf16.msra.mxu0 %v2157_v4  ;;  %228 = vst.msk [vmem:[#allocation2 + $0xc] sm:$0xff] %vm226_vm1, %v225_v14  ;;  %v1893_v15 = vld [vmem:[%s2832_s27 + $0x20] sm:$0xff]  ;;  %v1894_v16 = vld [vmem:[%s2832_s27 + $0x28] sm:$0xff]  ;;  %v1897_v17 = vld [vmem:[%s2832_s27 + $0xb0] sm:$0xff]  ;;  %s1751_s23 = sadd.s32 %s1958_s21, %s1954_s2  ;;  %s1754_s8 = sshll.u32 %s219_s9, 4  ;;  %s2921_s8 = int_to_ptr.vmem [resolvable:$true] %s1754_s8 }
  0x71   : > { %2168 = vmatpush3.bf16.msra.mxu1 %v2165_v8  ;;  %v1898_v18 = vld [vmem:[%s2832_s27 + $0xb8] sm:$0xff]  ;;  %v2173_v22 = vpack.c.bf16 %v1894_v16, %v1893_v15  ;;  %v1901_v24 = vld [vmem:[%s2832_s27 + $0x30] sm:$0xff]  ;;  %v1905_v26 = vld [vmem:[%s2832_s27 + $0xc0] sm:$0xff]  ;;  %s1955_s12 = sshll.u32 %s1751_s23, 7  ;;  %s3028_s25 = sld [smem:[#allocation15_spill]] }
  0x72   : > { %2162 = vmatprep.subr.bf16.mxu0 %v2161_v12  ;;  %2170 = vmatprep.subr.bf16.mxu1 %v2169_v13  ;;  %v2177_v23 = vpack.c.bf16 %v1898_v18, %v1897_v17  ;;  %v1902_v25 = vld [vmem:[%s2832_s27 + $0x38] sm:$0xff]  ;;  %v1906_v27 = vld [vmem:[%s2832_s27 + $0xc8] sm:$0xff]  ;;  %v1909_v32 = vld [vmem:[%s2832_s27 + $0x40] sm:$0xff]  ;;  %s1738_s15 = scalar_lea.sflag [#allocation5], %s2823_s24  ;;  %s2436_s16 = scalar_lea.vmem %s2921_s8, 512 }
  0x73   : > { %v2181_v30 = vpack.c.bf16 %v1902_v25, %v1901_v24  ;;  %v2185_v31 = vpack.c.bf16 %v1906_v27, %v1905_v26  ;;  %v1910_v33 = vld [vmem:[%s2832_s27 + $0x48] sm:$0xff]  ;;  %v1913_v34 = vld [vmem:[%s2832_s27 + $0xd0] sm:$0xff]  ;;  %v1914_v35 = vld [vmem:[%s2832_s27 + $0xd8] sm:$0xff]  ;;  %p2437_p0 = scmp.ne.s32.totalorder %s2921_s8, %s2436_s16  ;;  %p3029_p3 = scmp.ne.s32.totalorder %s3014_s3, 0 }
  0x74   : > { %v2189_v38 = vpack.c.bf16 %v1910_v33, %v1909_v32  ;;  %v2193_v39 = vpack.c.bf16 %v1914_v35, %v1913_v34  ;;  %v1917_v40 = vld [vmem:[%s2832_s27 + $0x50] sm:$0xff]  ;;  %v1918_v41 = vld [vmem:[%s2832_s27 + $0x58] sm:$0xff]  ;;  %v1921_v42 = vld [vmem:[%s2832_s27 + $0xe0] sm:$0xff]  ;;  %s2569_s30 = smov [#allocation8]  }
  0x75   : > { %v1922_v43 = vld [vmem:[%s2832_s27 + $0xe8] sm:$0xff]  ;;  %v2197_v46 = vpack.c.bf16 %v1918_v41, %v1917_v40  ;;  %v1925_v48 = vld [vmem:[%s2832_s27 + $0x60] sm:$0xff]  ;;  %v1929_v50 = vld [vmem:[%s2832_s27 + $0xf0] sm:$0xff]  ;;  %p2438_p7 = pnand %p2437_p0, %p3029_p3  ;;  %s2440_s29 = sshll.u32 %s2569_s30, 4  ;;  %s2441_s29 = int_to_ptr.vmem [resolvable:$false] %s2440_s29 }
  0x76   : > { %v236_v19 = vld [vmem:[#allocation2 + $0x1] sm:$0xff]  ;;  %v2201_v47 = vpack.c.bf16 %v1922_v43, %v1921_v42  ;;  %v1930_v51 = vld [vmem:[%s2832_s27 + $0xf8] sm:$0xff]  ;;  %v1937_v58 = vld [vmem:[%s2832_s27 + $0x100] sm:$0xff]  ;;  %s2442_s22 = scalar_lea.vmem %s2441_s29, 1024  ;;  %p2443_p12 = scmp.lt.s32.totalorder %s2921_s8, %s2441_s29 }
  0x77   : > { %2035 = vmatprep.mubr.msk.f32.mxu0 %vm226_vm1, %v236_v19  ;;  %2049 = vmatprep.mubr.msk.f32.mxu1 %vm226_vm1, %v236_v19  ;;  %v237_v20 = vld [vmem:[#allocation2 + $0x9] sm:$0xff]  ;;  %v229_v21 = vld [vmem:[#allocation2] sm:$0xff]  ;;  %v2209_v55 = vpack.c.bf16 %v1930_v51, %v1929_v50  ;;  %v1941_v0 = vld [vmem:[%s2832_s27 + $0x80] sm:$0xff]  ;;  %s2926_s6 = scalar_lea.hbm %s3028_s25, %s1955_s12  ;;  %p2439_p9 = pneg %p2438_p7 }
  0x78   : > { %2036 = vmatmul.mubr.msk.f32.vlgmr.msra.gmra.mrb[0].mxu0 %vm226_vm1, %v237_v20  ;;  %2050 = vmatmul.mubr.msk.f32.vlgmr.msra.gmra.mrb[0].mxu1 %vm226_vm1, %v237_v20  ;;  %v2862_v28 = vld [vmem:[#allocation2 + $0x8] sm:$0xff]  ;;  %v1926_v49 = vld [vmem:[%s2832_s27 + $0x68] sm:$0xff]  ;;  %v1934_v57 = vld [vmem:[%s2832_s27 + $0x78] sm:$0xff]  ;;  %p2444_p5 = scmp.lt.s32.totalorder %s2442_s22, %s2436_s16 }
  0x79   : > { %2164 = vmatpush3.bf16.msra.mxu0 %v2161_v12  ;;  %2172 = vmatpush3.bf16.msra.mxu1 %v2169_v13  ;;  %v556_v29 = vld [vmem:[#allocation2 + $0x2] sm:$0xff]  ;;  %v557_v36 = vld [vmem:[#allocation2 + $0xa] sm:$0xff]  ;;  %v2205_v54 = vpack.c.bf16 %v1926_v49, %v1925_v48 }
  0x7a   : > { %2042 = vmatprep.mubr.msk.f32.mxu0 %vm226_vm1, %v229_v21  ;;  %2056 = vmatprep.mubr.msk.f32.mxu1 %vm226_vm1, %v229_v21  ;;  %v724_v37 = vld [vmem:[#allocation2 + $0x3] sm:$0xff]  ;;  %v725_v44 = vld [vmem:[#allocation2 + $0xb] sm:$0xff]  ;;  %p2445_p1 = por %p2444_p5, %p2443_p12 }
  0x7b   : > { %2174 = vmatprep.subr.bf16.mxu0 %v2173_v22  ;;  %2178 = vmatprep.subr.bf16.mxu1 %v2177_v23  ;;  %v892_v45 = vld [vmem:[#allocation2 + $0x4] sm:$0xff]  ;;  %v893_v52 = vld [vmem:[#allocation2 + $0xc] sm:$0xff] }
  0x7c   : > { %v1060_v53 = vld [vmem:[#allocation2 + $0x5] sm:$0xff]  ;;  %v1061_v60 = vld [vmem:[#allocation2 + $0xd] sm:$0xff]  ;;  %p2446_p6 = pnand %p2445_p1, %p2439_p9 }
  0x7d   : > { %v1933_v56 = vld [vmem:[%s2832_s27 + $0x70] sm:$0xff]  ;;  %v1938_v59 = vld [vmem:[%s2832_s27 + $0x108] sm:$0xff]  ;;  %v1946_v3 = vld [vmem:[%s2832_s27 + $0x118] sm:$0xff] }
  0x7e   : > { %v1228_v61 = vld [vmem:[#allocation2 + $0x6] sm:$0xff]  ;;  %v2213_v62 = vpack.c.bf16 %v1934_v57, %v1933_v56  ;;  %v2217_v63 = vpack.c.bf16 %v1938_v59, %v1937_v58  ;;  %v1229_v4 = vld [vmem:[#allocation2 + $0xe] sm:$0xff] }
  0x7f   : > { %v1942_v1 = vld [vmem:[%s2832_s27 + $0x88] sm:$0xff]  ;;  %v1945_v2 = vld [vmem:[%s2832_s27 + $0x110] sm:$0xff]  ;;  %v1565_v9 = vld [vmem:[#allocation2 + $0x10] sm:$0xff] }
  0x80   : > { %2043 = vmatmul.mubr.msk.f32.vlgmr.msra.gmra.mrb[0].mxu0 %vm226_vm1, %v2862_v28  ;;  %2057 = vmatmul.mubr.msk.f32.vlgmr.msra.gmra.mrb[0].mxu1 %vm226_vm1, %v2862_v28  ;;  %v1396_v5 = vld [vmem:[#allocation2 + $0x7] sm:$0xff]  ;;  %v2221_v6 = vpack.c.bf16 %v1942_v1, %v1941_v0  ;;  %v2225_v7 = vpack.c.bf16 %v1946_v3, %v1945_v2  ;;  %v1397_v8 = vld [vmem:[#allocation2 + $0xf] sm:$0xff] }
  0x81   : > { %2176 = vmatpush3.bf16.msra.mxu0 %v2173_v22  ;;  %2180 = vmatpush3.bf16.msra.mxu1 %v2177_v23 }
  0x82   : > { %2063 = vmatprep.mubr.msk.f32.mxu0 %vm226_vm1, %v556_v29  ;;  %2070 = vmatprep.mubr.msk.f32.mxu1 %vm226_vm1, %v556_v29 }
  0x83   : > { %2182 = vmatprep.subr.bf16.mxu0 %v2181_v30  ;;  %2186 = vmatprep.subr.bf16.mxu1 %v2185_v31 }
  0x88   : > { %2064 = vmatmul.mubr.msk.f32.vlgmr.msra.gmra.mrb[0].mxu0 %vm226_vm1, %v557_v36  ;;  %2071 = vmatmul.mubr.msk.f32.vlgmr.msra.gmra.mrb[0].mxu1 %vm226_vm1, %v557_v36 }
  0x89   : > { %2184 = vmatpush3.bf16.msra.mxu0 %v2181_v30  ;;  %2188 = vmatpush3.bf16.msra.mxu1 %v2185_v31 }
  0x8a   : > { %2077 = vmatprep.mubr.msk.f32.mxu0 %vm226_vm1, %v724_v37  ;;  %2084 = vmatprep.mubr.msk.f32.mxu1 %vm226_vm1, %v724_v37 }
  0x8b   : > { %2190 = vmatprep.subr.bf16.mxu0 %v2189_v38  ;;  %2194 = vmatprep.subr.bf16.mxu1 %v2193_v39 }
  0x90   : > { %2078 = vmatmul.mubr.msk.f32.vlgmr.msra.gmra.mrb[0].mxu0 %vm226_vm1, %v725_v44  ;;  %2085 = vmatmul.mubr.msk.f32.vlgmr.msra.gmra.mrb[0].mxu1 %vm226_vm1, %v725_v44 }
  0x91   : > { %2192 = vmatpush3.bf16.msra.mxu0 %v2189_v38  ;;  %2196 = vmatpush3.bf16.msra.mxu1 %v2193_v39 }
  0x92   : > { %2091 = vmatprep.mubr.msk.f32.mxu0 %vm226_vm1, %v892_v45  ;;  %2098 = vmatprep.mubr.msk.f32.mxu1 %vm226_vm1, %v892_v45 }
  0x93   : > { %2198 = vmatprep.subr.bf16.mxu0 %v2197_v46  ;;  %2202 = vmatprep.subr.bf16.mxu1 %v2201_v47 }
  0x98   : > { %2092 = vmatmul.mubr.msk.f32.vlgmr.msra.gmra.mrb[0].mxu0 %vm226_vm1, %v893_v52  ;;  %2099 = vmatmul.mubr.msk.f32.vlgmr.msra.gmra.mrb[0].mxu1 %vm226_vm1, %v893_v52 }
  0x99   : > { %2200 = vmatpush3.bf16.msra.mxu0 %v2197_v46  ;;  %2204 = vmatpush3.bf16.msra.mxu1 %v2201_v47 }
  0x9a   : > { %2105 = vmatprep.mubr.msk.f32.mxu0 %vm226_vm1, %v1060_v53  ;;  %2112 = vmatprep.mubr.msk.f32.mxu1 %vm226_vm1, %v1060_v53 }
  0x9b   : > { %2206 = vmatprep.subr.bf16.mxu0 %v2205_v54  ;;  %2210 = vmatprep.subr.bf16.mxu1 %v2209_v55 }
  0xa0   : > { %2106 = vmatmul.mubr.msk.f32.vlgmr.msra.gmra.mrb[0].mxu0 %vm226_vm1, %v1061_v60  ;;  %2113 = vmatmul.mubr.msk.f32.vlgmr.msra.gmra.mrb[0].mxu1 %vm226_vm1, %v1061_v60 }
  0xa1   : > { %2208 = vmatpush3.bf16.msra.mxu0 %v2205_v54  ;;  %2212 = vmatpush3.bf16.msra.mxu1 %v2209_v55 }
  0xa2   : > { %2119 = vmatprep.mubr.msk.f32.mxu0 %vm226_vm1, %v1228_v61  ;;  %2126 = vmatprep.mubr.msk.f32.mxu1 %vm226_vm1, %v1228_v61 }
  0xa3   : > { %2214 = vmatprep.subr.bf16.mxu0 %v2213_v62  ;;  %2218 = vmatprep.subr.bf16.mxu1 %v2217_v63 }
  0xa8   : > { %2120 = vmatmul.mubr.msk.f32.vlgmr.msra.gmra.mrb[0].mxu0 %vm226_vm1, %v1229_v4  ;;  %2127 = vmatmul.mubr.msk.f32.vlgmr.msra.gmra.mrb[0].mxu1 %vm226_vm1, %v1229_v4 }
  0xa9   : > { %2216 = vmatpush3.bf16.msra.mxu0 %v2213_v62  ;;  %2220 = vmatpush3.bf16.msra.mxu1 %v2217_v63 }
  0xaa   : > { %2133 = vmatprep.mubr.msk.f32.mxu0 %vm226_vm1, %v1396_v5  ;;  %2140 = vmatprep.mubr.msk.f32.mxu1 %vm226_vm1, %v1396_v5 }
  0xab   : > { %2222 = vmatprep.subr.bf16.mxu0 %v2221_v6  ;;  %2226 = vmatprep.subr.bf16.mxu1 %v2225_v7 }
  0xb0   : > { %2134 = vmatmul.mubr.msk.f32.vlgmr.msra.gmra.mrb[0].mxu0 %vm226_vm1, %v1397_v8  ;;  %2141 = vmatmul.mubr.msk.f32.vlgmr.msra.gmra.mrb[0].mxu1 %vm226_vm1, %v1397_v8 }
  0xb1   : > { %2224 = vmatpush3.bf16.msra.mxu0 %v2221_v6  ;;  %2228 = vmatpush3.bf16.msra.mxu1 %v2225_v7 }
  0xb2   : > { %2147 = vmatprep.mubr.msk.f32.mxu0 %vm226_vm1, %v2862_v28  ;;  %2154 = vmatprep.mubr.msk.f32.mxu1 %vm226_vm1, %v2862_v28 }
  0xb8   : > { %2148 = vmatmul.mubr.msk.f32.vlgmr.msra.gmra.mrb[0].mxu0 %vm226_vm1, %v1565_v9  ;;  %2155 = vmatmul.mubr.msk.f32.vlgmr.msra.gmra.mrb[0].mxu1 %vm226_vm1, %v1565_v9 }
 0x18b   : > { %v2149_v10 = vpop.f32.mrb[0].mxu0  ;;  %v2156_v11 = vpop.f32.mrb[0].mxu1 }
 0x18c   : > { %1733 = vst.msk [vmem:[%s219_s9 + $0x8] sm:$0xff] %vm226_vm1, %v2149_v10  ;;  %1950 = vst.msk [vmem:[%s219_s9 + $0x18] sm:$0xff] %vm226_vm1, %v2156_v11  ;;  %v1641_v12 = vpop.f32.mrb[1].mxu0  ;;  %v1721_v13 = vpop.f32.mrb[1].mxu1 }
 0x18d   : > { %1732 = vst.msk [vmem:[%s219_s9] sm:$0xff] %vm226_vm1, %v1641_v12  ;;  %1949 = vst.msk [vmem:[%s219_s9 + $0x10] sm:$0xff] %vm226_vm1, %v1721_v13 }
 0x18e   : > { %2449 = shalt.err (!%p2446_p6)
}
 0x18f   : > { %s2450_s27 = scalar_lea.hbm %s2926_s6, 512  ;;  %s2454_s2 = scalar_lea.hbm %s3028_s25, 4096 }
 0x190   : > { %p2451_p2 = scmp.ne.s32.totalorder %s2926_s6, %s2450_s27  ;;  %p2455_p4 = scmp.lt.u32.totalorder %s2926_s6, %s3028_s25 }
 0x191   : > { %p2456_p10 = scmp.lt.u32.totalorder %s2454_s2, %s2450_s27  ;;  %p2458_p0 = scmp.lt.u32.totalorder %s2450_s27, %s2926_s6 }
 0x192   : > { %p2452_p8 = pnand %p2451_p2, %p3029_p3 }
 0x193   : > { %p2457_p11 = por %p2456_p10, %p2455_p4 }
 0x194   : > { %p2453_p13 = pneg %p2452_p8 }
 0x195   : > { %p2459_p7 = por %p2458_p0, %p2457_p11 }
 0x197   : > { %p2460_p9 = pnand %p2459_p7, %p2453_p13 }
 0x199   : > { %2463 = shalt.err (!%p2460_p9)
}
 0x19a   : > { %s2570_s12 = smov 128   ;;  %s2571_s26 = smov 8  }
 0x19b   : > { %2268 = dma.vmem_to_hbm [thread:$0]  (%p3029_p3), %s2921_s8, 512, %s2926_s6, %s1738_s15, %s2570_s12, %s2570_s12, %s2571_s26  }
 0x19c PF: > { %s3030_s7 = sld [smem:[#allocation12_spill]]  ;;  %p2282_p12 = scmp.ge.s32.totalorder %s2562_s19, 2 }
 0x19d   : > { %p3031_p5 = scmp.ne.s32.totalorder %s3015_s4, 0 }
 0x19f   : > { %p2278_p1 = pnand %p2282_p12, %p3031_p5 }
 0x1a2   : > { %s1769_s16 = sand.u32 1, %s3030_s7  }
 0x1a3   : > { %s1770_s30 = scalar_lea.sflag [#allocation5], %s1769_s16 }
 0x1a4   : > { %2517 = dma.done.wait (!%p2278_p1), %s1770_s30, 512  }
 0x1a5   : > { %2519 = vsyncadd (!%p2278_p1), %s1770_s30, 4294966784  ;;  %s21_s19 = sadd.s32 1, %s2562_s19   ;;  %s3032_s3 = sld [smem:[#allocation13_spill]] }
 0x1a6   : > { %p18_p6 = scmp.ge.s32.totalorder %s21_s19, 10   ;;  %s3033_s24 = sld [smem:[#allocation14_spill]] }
 0x1a7   : > { %s3034_s9 = smov %s2526_s10  ;;  %s3035_s10 = smov %s2530_s11 }
 0x1a8   : > { %s3036_s11 = smov %s2762_s20  ;;  %s3037_s12 = smov %s2538_s13 }
 0x1a9   : > { %s3038_s13 = smov %s2542_s14  ;;  %s3039_s14 = smov %s2697_s5 }
 0x1aa   : > { %s3040_s15 = smov %s2554_s17  ;;  %s3041_s16 = smov %s2558_s18 }
 0x1ab   : > { %s3042_s17 = smov %s3032_s3  ;;  %20 = sbr.rel (!%p18_p6) target bundleno = 13 (0xd), region = 104 }
 0x1ac   : > { %s3043_s18 = smov %s3033_s24 }
 0x1b2   :  { %1775 = vsyncpa [#allocation4], 1 }
 0x1b3   :  { %1777 = vsyncpa [#allocation4 + $0x1], 1 }
 0x1b4   :  { %1778 = vsyncpa [#allocation7], 1 }
 0x1b5   :  { %1780 = vsyncpa [#allocation7 + $0x1], 1 }
 0x1b6   :  { %1781 = vsyncpa [#allocation5], 1 }
 0x1b7   :  { %1783 = vsyncpa [#allocation5 + $0x1], 1 }

</bundles_post_ra>
